<compile_context>
chip_gen: v6e
topology: v6e:2x2x1
jax: 0.10.0
libtpu: 0.0.40
codegen_flags: <defaults>
</compile_context>

<pallas_src>
import functools

import jax
import jax.numpy as jnp
from jax.experimental import pallas as pl
from jax.experimental.pallas import tpu as pltpu


def _round_up(n, m):
    return ((n + m - 1) // m) * m


def _pad_to(arr, shape):
    pads = [(0, s - d) for d, s in zip(arr.shape, shape)]
    if all(p == (0, 0) for p in pads):
        return arr
    return jnp.pad(arr, pads)


def mlp_kernel(x_ref, w1_ref, b1_ref, w2_ref, b2_ref, out_ref):
    # Hidden layer: (tb, d_in) @ (d_in, h_p) + (1, h_p) -> ReLU   (f32 accumulate)
    h = jnp.dot(x_ref[...], w1_ref[...], preferred_element_type=jnp.float32)
    h = jnp.maximum(h + b1_ref[...], 0.0)
    # Output layer: (tb, h_p) @ (h_p, d_out) + (1, d_out)          (f32 accumulate)
    y = jnp.dot(h.astype(w2_ref.dtype), w2_ref[...],
                preferred_element_type=jnp.float32)
    out_ref[...] = (y + b2_ref[...]).astype(out_ref.dtype)


@functools.partial(jax.jit, static_argnames=("block_b", "weight_dtype"))
def mlp_forward(x, w1, b1, w2, b2, *, block_b=1024, weight_dtype=jnp.bfloat16):
    """x: (B, D_in); w1: (D_in, H); b1: (1, H); w2: (H, D_out); b2: (1, D_out)."""
    B, d_in = x.shape
    h = w1.shape[1]
    d_out = w2.shape[1]

    compute_dtype = jnp.dtype(weight_dtype if weight_dtype is not None else x.dtype)
    out_dtype = x.dtype

    # Hidden dim padded to a lane multiple (weights are tiny & VMEM-resident, so
    # this costs nothing per-tile).  x / out keep their real feature widths.
    h_p = _round_up(h, 128)

    # Batch tile: multiple of 16 rows for bf16 sublane packing (8 for f32); large
    # tiles to amortize ~0.35us/step overhead, but keep >=2 grid steps when the
    # batch allows so v7x megacore can shard the "parallel" axis across both TCs.
    row_align = 16 if compute_dtype == jnp.dtype(jnp.bfloat16) else 8
    tb = _round_up(max(row_align, min(block_b, B)), row_align)
    if B >= 2 * row_align and _round_up(B, tb) // tb < 2:
        tb = _round_up(-(-B // 2), row_align)
    b_p = _round_up(B, tb)

    x_p = _pad_to(x, (b_p, d_in)).astype(compute_dtype)      # batch pad only (zeros)
    w1_p = _pad_to(w1, (d_in, h_p)).astype(compute_dtype)
    b1_p = _pad_to(b1, (1, h_p)).astype(jnp.float32)
    w2_p = _pad_to(w2, (h_p, d_out)).astype(compute_dtype)
    b2_p = b2.astype(jnp.float32)
    # Zero padding keeps the math exact: padded hidden cols get bias 0 -> relu 0,
    # padded w2 rows are zero, padded batch rows are sliced away below.

    grid = (b_p // tb,)
    itemsize = compute_dtype.itemsize
    cost = pl.CostEstimate(
        flops=2 * B * (d_in * h + h * d_out),
        transcendentals=0,
        bytes_accessed=(B * d_in + d_in * h + h * d_out) * itemsize
        + (h + d_out) * 4
        + B * d_out * jnp.dtype(out_dtype).itemsize,
    )

    out_p = pl.pallas_call(
        mlp_kernel,
        out_shape=jax.ShapeDtypeStruct((b_p, d_out), out_dtype),
        grid=grid,
        in_specs=[
            pl.BlockSpec((tb, d_in), lambda i: (i, 0)),     # x: streamed per tile
            pl.BlockSpec((d_in, h_p), lambda i: (0, 0)),    # weights: VMEM-resident
            pl.BlockSpec((1, h_p), lambda i: (0, 0)),
            pl.BlockSpec((h_p, d_out), lambda i: (0, 0)),
            pl.BlockSpec((1, d_out), lambda i: (0, 0)),
        ],
        out_specs=pl.BlockSpec((tb, d_out), lambda i: (i, 0)),
        compiler_params=pltpu.CompilerParams(
            dimension_semantics=("parallel",),   # shard batch tiles across TCs (v7x)
        ),
        cost_estimate=cost,
    )(x_p, w1_p, b1_p, w2_p, b2_p)

    # Only batch-pad rows need slicing; feature dims were never padded.
    return out_p[:B]


def init_params(key, input_size, hidden=64, out=2):
    # Deterministic init mimicking nn.Linear's uniform(-1/sqrt(fan_in), 1/sqrt(fan_in)).
    k1, k2, k3, k4 = jax.random.split(key, 4)
    lim1 = 1.0 / jnp.sqrt(input_size)
    lim2 = 1.0 / jnp.sqrt(hidden)
    # Stored transposed relative to PyTorch: (in, out) so kernel does x @ W.
    w1 = jax.random.uniform(k1, (input_size, hidden), jnp.float32, -lim1, lim1)
    b1 = jax.random.uniform(k2, (1, hidden), jnp.float32, -lim1, lim1)
    w2 = jax.random.uniform(k3, (hidden, out), jnp.float32, -lim2, lim2)
    b2 = jax.random.uniform(k4, (1, out), jnp.float32, -lim2, lim2)
    return w1, b1, w2, b2


if __name__ == "__main__":
    key = jax.random.PRNGKey(0)
    kx, kp = jax.random.split(key)

    batch, input_size = 8, 32
    x = jax.random.normal(kx, (batch, input_size), jnp.float32)
    w1, b1, w2, b2 = init_params(kp, input_size)

    # Reference in plain JAX (same math as the PyTorch forward).
    ref = jnp.maximum(x @ w1 + b1, 0.0) @ w2 + b2

    # 1) Exact f32 compute path.
    out_f32 = mlp_forward(x, w1, b1, w2, b2, weight_dtype=jnp.float32)
    jax.block_until_ready(out_f32)
    assert out_f32.shape == (batch, 2)
    assert jnp.allclose(out_f32, ref, atol=1e-5, rtol=1e-5), "f32 mismatch vs reference"

    # 2) Default bf16 compute path (inputs/weights bf16, f32 accumulation).
    out_bf16 = mlp_forward(x, w1, b1, w2, b2)
    jax.block_until_ready(out_bf16)
    assert out_bf16.shape == (batch, 2)
    assert jnp.allclose(out_bf16, ref, atol=3e-2, rtol=3e-2), "bf16 mismatch vs reference"

    # 3) Multi-tile batch grid path (several pipelined / megacore-parallel steps).
    big_b = 1024
    xb = jax.random.normal(kx, (big_b, input_size), jnp.float32)
    out_big = mlp_forward(xb, w1, b1, w2, b2)
    jax.block_until_ready(out_big)
    ref_big = jnp.maximum(xb @ w1 + b1, 0.0) @ w2 + b2
    assert out_big.shape == (big_b, 2)
    assert jnp.allclose(out_big, ref_big, atol=3e-2, rtol=3e-2), "big-batch mismatch"

    print("KERNEL_OK")
</pallas_src>

<mosaic_0001>
module attributes {stable_mosaic.version = 11 : i64} {
  func.func @mlp_kernel(%arg0: i32, %arg1: memref<8x32xf32, #tpu.memory_space<vmem>>, %arg2: memref<32x128xf32, #tpu.memory_space<vmem>>, %arg3: memref<1x128xf32, #tpu.memory_space<vmem>>, %arg4: memref<128x2xf32, #tpu.memory_space<vmem>>, %arg5: memref<1x2xf32, #tpu.memory_space<vmem>>, %arg6: memref<8x2xf32, #tpu.memory_space<vmem>>) attributes {dimension_semantics = [#tpu.dimension_semantics<parallel>], iteration_bounds = array<i64: 1>, scalar_prefetch = 0 : i64, scratch_operands = 0 : i64, tpu.core_type = #tpu.core_type<tc>, window_params = [{transform_indices = @transform_0, window_bounds = array<i64: 8, 32>}, {pipeline_mode = #tpu.pipeline_mode<synchronous>, transform_indices = @transform_1, window_bounds = array<i64: 32, 128>}, {pipeline_mode = #tpu.pipeline_mode<synchronous>, transform_indices = @transform_2, window_bounds = array<i64: 1, 128>}, {pipeline_mode = #tpu.pipeline_mode<synchronous>, transform_indices = @transform_3, window_bounds = array<i64: 128, 2>}, {pipeline_mode = #tpu.pipeline_mode<synchronous>, transform_indices = @transform_4, window_bounds = array<i64: 1, 2>}, {transform_indices = @transform_5, window_bounds = array<i64: 8, 2>}]} {
    %c0 = arith.constant 0 : index
    %c0_0 = arith.constant 0 : index
    %0 = vector.load %arg1[%c0, %c0_0] : memref<8x32xf32, #tpu.memory_space<vmem>>, vector<8x32xf32>
    %c0_1 = arith.constant 0 : index
    %c0_2 = arith.constant 0 : index
    %1 = vector.load %arg2[%c0_1, %c0_2] : memref<32x128xf32, #tpu.memory_space<vmem>>, vector<32x128xf32>
    %cst = arith.constant dense<0.000000e+00> : vector<8x128xf32>
    %2 = tpu.matmul %0, %1, %cst {dimension_numbers = #tpu.dot_dimension_numbers<[1], [0], [0], [1], [0, 0, 1, 1], [], []>} : vector<8x32xf32>, vector<32x128xf32>, vector<8x128xf32> -> vector<8x128xf32>
    %c0_3 = arith.constant 0 : index
    %c0_4 = arith.constant 0 : index
    %3 = vector.load %arg3[%c0_3, %c0_4] : memref<1x128xf32, #tpu.memory_space<vmem>>, vector<1x128xf32>
    %4 = vector.broadcast %3 : vector<1x128xf32> to vector<8x128xf32>
    %5 = arith.addf %2, %4 : vector<8x128xf32>
    %cst_5 = arith.constant 0.000000e+00 : f32
    %6 = vector.broadcast %cst_5 : f32 to vector<8x128xf32>
    %7 = arith.maximumf %5, %6 : vector<8x128xf32>
    %c0_6 = arith.constant 0 : index
    %c0_7 = arith.constant 0 : index
    %8 = vector.load %arg4[%c0_6, %c0_7] : memref<128x2xf32, #tpu.memory_space<vmem>>, vector<128x2xf32>
    %cst_8 = arith.constant dense<0.000000e+00> : vector<8x2xf32>
    %9 = tpu.matmul %7, %8, %cst_8 {dimension_numbers = #tpu.dot_dimension_numbers<[1], [0], [0], [1], [0, 0, 1, 1], [], []>} : vector<8x128xf32>, vector<128x2xf32>, vector<8x2xf32> -> vector<8x2xf32>
    %c0_9 = arith.constant 0 : index
    %c0_10 = arith.constant 0 : index
    %10 = vector.load %arg5[%c0_9, %c0_10] : memref<1x2xf32, #tpu.memory_space<vmem>>, vector<1x2xf32>
    %11 = vector.broadcast %10 : vector<1x2xf32> to vector<8x2xf32>
    %12 = arith.addf %9, %11 : vector<8x2xf32>
    %c0_11 = arith.constant 0 : index
    %c0_12 = arith.constant 0 : index
    %13 = vector.load %arg6[%c0_11, %c0_12] : memref<8x2xf32, #tpu.memory_space<vmem>>, vector<8x2xf32>
    tpu.vector_store %arg6[%c0_11, %c0_12], %12 {strides = array<i32>} : memref<8x2xf32, #tpu.memory_space<vmem>>, vector<8x2xf32>,
    return
  }
  func.func @transform_0(%arg0: i32) -> (i32, i32) {
    %c0_i32 = arith.constant 0 : i32
    %c0_i32_0 = arith.constant 0 : i32
    return %arg0, %c0_i32 : i32, i32
  }
  func.func @transform_1(%arg0: i32) -> (i32, i32) {
    %c0_i32 = arith.constant 0 : i32
    %c0_i32_0 = arith.constant 0 : i32
    %c0_i32_1 = arith.constant 0 : i32
    return %c0_i32, %c0_i32_0 : i32, i32
  }
  func.func @transform_2(%arg0: i32) -> (i32, i32) {
    %c0_i32 = arith.constant 0 : i32
    %c0_i32_0 = arith.constant 0 : i32
    %c0_i32_1 = arith.constant 0 : i32
    return %c0_i32, %c0_i32_0 : i32, i32
  }
  func.func @transform_3(%arg0: i32) -> (i32, i32) {
    %c0_i32 = arith.constant 0 : i32
    %c0_i32_0 = arith.constant 0 : i32
    %c0_i32_1 = arith.constant 0 : i32
    return %c0_i32, %c0_i32_0 : i32, i32
  }
  func.func @transform_4(%arg0: i32) -> (i32, i32) {
    %c0_i32 = arith.constant 0 : i32
    %c0_i32_0 = arith.constant 0 : i32
    %c0_i32_1 = arith.constant 0 : i32
    return %c0_i32, %c0_i32_0 : i32, i32
  }
  func.func @transform_5(%arg0: i32) -> (i32, i32) {
    %c0_i32 = arith.constant 0 : i32
    %c0_i32_0 = arith.constant 0 : i32
    return %arg0, %c0_i32 : i32, i32
  }
}

</mosaic_0001>

<bundles_post_ra>
// kernel: mlp_forward.1
= control target key start
LH: loop header
LB: loop body
LE: loop exit
PB: predicated region body
PF: predicated region fallthrough
CT: control target
= control target key end

     0   :  { %v279_v0 = vmov 0.0   ;;  %vm280_vm0 = vmmov 0   ;;  %vm32_vm1 = vcmask 261120   ;;  %vm200_vm2 = vcmask 15360   ;;  %s407_s1 = inlined_call_operand.vmem [shape: f32[32,128], index: 1, kind: input, shape index: {}]   ;;  %s408_s3 = inlined_call_operand.vmem [shape: f32[128,2], index: 3, kind: input, shape index: {}]   ;;  %s409_s0 = inlined_call_operand.vmem [shape: f32[8,32], index: 0, kind: input, shape index: {}]   ;;  %s410_s2 = inlined_call_operand.vmem [shape: f32[1,128], index: 2, kind: input, shape index: {}]   ;;  %s411_s4 = inlined_call_operand.vmem [shape: f32[1,2], index: 4, kind: input, shape index: {}]   ;;  %s412_s5 = inlined_call_operand.vmem [shape: f32[8,2], index: 5, kind: output, shape index: {}]  }
   0x1   :  { %231 = vmatprep.subr.mxu0 %v279_v0  ;;  %v24_v1 = vld [vmem:[%s407_s1 + $0x18] sm:$0xff]  ;;  %v23_v2 = vld [vmem:[%s407_s1 + $0x10] sm:$0xff]  ;;  %239 = vmatprep.mubr.msk.f32.mxu0 %vm280_vm0, %v279_v0  ;;  %v22_v4 = vld [vmem:[%s407_s1 + $0x8] sm:$0xff] }
   0x2   :  { %232 = vmatpush3.msra.mxu0 %v24_v1  ;;  %242 = vmatprep.subr.mxu1 %v279_v0  ;;  %v122_v3 = vld [vmem:[%s408_s3 + $0x78] sm:$0xff]  ;;  %v121_v5 = vld [vmem:[%s408_s3 + $0x70] sm:$0xff]  ;;  %v120_v6 = vld [vmem:[%s408_s3 + $0x68] sm:$0xff] }
   0x3   :  { %233 = vmatprep.subr.mxu0 %v279_v0  ;;  %243 = vmatpush3.msra.mxu1 %v122_v3  ;;  %v21_v7 = vld [vmem:[%s407_s1] sm:$0xff]  ;;  %v118_v10 = vld [vmem:[%s408_s3 + $0x58] sm:$0xff]  ;;  %v117_v11 = vld [vmem:[%s408_s3 + $0x50] sm:$0xff] }
   0x4   :  { %234 = vmatpush3.msra.mxu0 %v23_v2  ;;  %244 = vmatprep.subr.mxu1 %v279_v0  ;;  %v20_v8 = vld [vmem:[%s409_s0] sm:$0xff]  ;;  %v116_v12 = vld [vmem:[%s408_s3 + $0x48] sm:$0xff]  ;;  %v114_v14 = vld [vmem:[%s408_s3 + $0x38] sm:$0xff] }
   0x5   :  { %235 = vmatprep.subr.mxu0 %v279_v0  ;;  %245 = vmatpush3.msra.mxu1 %v121_v5  ;;  %v119_v9 = vld [vmem:[%s408_s3 + $0x60] sm:$0xff]  ;;  %v113_v15 = vld [vmem:[%s408_s3 + $0x30] sm:$0xff]  ;;  %v112_v16 = vld [vmem:[%s408_s3 + $0x28] sm:$0xff] }
   0x6   :  { %236 = vmatpush3.msra.mxu0 %v22_v4  ;;  %246 = vmatprep.subr.mxu1 %v279_v0  ;;  %v115_v13 = vld [vmem:[%s408_s3 + $0x40] sm:$0xff]  ;;  %v110_v18 = vld [vmem:[%s408_s3 + $0x18] sm:$0xff]  ;;  %v109_v19 = vld [vmem:[%s408_s3 + $0x10] sm:$0xff] }
   0x7   :  { %237 = vmatprep.subr.mxu0 %v279_v0  ;;  %247 = vmatpush3.msra.mxu1 %v120_v6  ;;  %v111_v17 = vld [vmem:[%s408_s3 + $0x20] sm:$0xff]  ;;  %v108_v20 = vld [vmem:[%s408_s3 + $0x8] sm:$0xff] }
   0x8   :  { %238 = vmatpush3.msra.mxu0 %v21_v7  ;;  %248 = vmatprep.subr.mxu1 %v279_v0  ;;  %v107_v21 = vld [vmem:[%s408_s3] sm:$0xff] }
   0x9   :  { %240 = vmatmul.mubr.msk.f32.vlgmr.msra.gmra.mxu0 %vm32_vm1, %v20_v8  ;;  %249 = vmatpush3.msra.mxu1 %v119_v9  ;;  %v206_v22 = vld [vmem:[%s410_s2] ss:$0 sm:$0xff] }
   0xa   :  { %250 = vmatprep.subr.mxu1 %v279_v0  ;;  %274 = vmatprep.mubr.msk.f32.mxu1 %vm280_vm0, %v279_v0  ;;  %v208_v27 = vld [vmem:[%s411_s4] ss:$0 sm:$0xff] }
   0xb   :  { %251 = vmatpush3.msra.mxu1 %v118_v10 }
   0xc   :  { %252 = vmatprep.subr.mxu1 %v279_v0 }
   0xd   :  { %253 = vmatpush3.msra.mxu1 %v117_v11 }
   0xe   :  { %254 = vmatprep.subr.mxu1 %v279_v0 }
   0xf   :  { %255 = vmatpush3.msra.mxu1 %v116_v12 }
  0x10   :  { %256 = vmatprep.subr.mxu1 %v279_v0 }
  0x11   :  { %257 = vmatpush3.msra.mxu1 %v115_v13 }
  0x12   :  { %258 = vmatprep.subr.mxu1 %v279_v0 }
  0x13   :  { %259 = vmatpush3.msra.mxu1 %v114_v14 }
  0x14   :  { %260 = vmatprep.subr.mxu1 %v279_v0 }
  0x15   :  { %261 = vmatpush3.msra.mxu1 %v113_v15 }
  0x16   :  { %262 = vmatprep.subr.mxu1 %v279_v0 }
  0x17   :  { %263 = vmatpush3.msra.mxu1 %v112_v16 }
  0x18   :  { %264 = vmatprep.subr.mxu1 %v279_v0 }
  0x19   :  { %265 = vmatpush3.msra.mxu1 %v111_v17 }
  0x1a   :  { %266 = vmatprep.subr.mxu1 %v279_v0 }
  0x1b   :  { %267 = vmatpush3.msra.mxu1 %v110_v18 }
  0x1c   :  { %268 = vmatprep.subr.mxu1 %v279_v0 }
  0x1d   :  { %269 = vmatpush3.msra.mxu1 %v109_v19 }
  0x1e   :  { %270 = vmatprep.subr.mxu1 %v279_v0 }
  0x1f   :  { %271 = vmatpush3.msra.mxu1 %v108_v20 }
  0x20   :  { %272 = vmatprep.subr.mxu1 %v279_v0 }
  0x21   :  { %273 = vmatpush3.msra.mxu1 %v107_v21 }
  0xc9   :  { %v102_v23 = vpop.f32.mrf.mxu0 }
  0xca   :  { %v103_v24 = vadd.f32 %v206_v22, %v102_v23 }
  0xcb   :  { %v241_v25 = vpop.f32.mrf.mxu0 }
  0xcc   :  { %v106_v26 = vmax.f32 %v103_v24, 0.0 }
  0xce   :  { %275 = vmatmul.mubr.f32.vlgmr.msra.gmra.mxu1 %v106_v26 }
 0x18e   :  { %v196_v28 = vpop.f32.mrf.mxu1 }
 0x18f   :  { %v197_v29 = vadd.f32 %v208_v27, %v196_v28 }
 0x190   :  { %v276_v30 = vpop.f32.mrf.mxu1 }
 0x191   :  { %201 = vst.msk [vmem:[%s412_s5] sm:$0xff] %vm200_vm2, %v197_v29 }

</bundles_post_ra>
